<compile_context>
chip_gen: v7x
topology: tpu7x:2x2x1
jax: 0.10.0
libtpu: 0.0.40
codegen_flags: <defaults>
</compile_context>

<pallas_src>
import functools

import jax
import jax.numpy as jnp
from jax.experimental import pallas as pl
from jax.experimental.pallas import tpu as pltpu

INPUT_DIM = 4
LATENT_DIM = 2
HIDDEN_DIM = 32
TAU_LATENT_DIM = 2
F = 128                 # padded feature width (lane dimension)
PACK_W = 8              # lane width of the packed host-side input
BN_EPS = 1e-5
LEAKY = 0.2
INV_STD = (1.0 + BN_EPS) ** -0.5   # eval-mode BatchNorm1d at init state

# The lane-packing below requires the encoder-input lanes [0, INPUT_DIM-2) and
# the query-point lanes [LATENT_DIM, LATENT_DIM+2) not to overlap.
assert INPUT_DIM - 2 <= LATENT_DIM

# Output lane layout of the single packed output.
LANE_MU = 0
LANE_LOGVAR = LATENT_DIM                 # 2
LANE_TAU = 2 * LATENT_DIM                # 4
LANE_SDF = LANE_TAU + 1                  # 5
LANE_XREC = LANE_SDF + 1                 # 6

# (in_features, out_features) of every nn.Linear, in a fixed order (torch order).
LAYER_DIMS = [
    (INPUT_DIM - 2, HIDDEN_DIM),        # 0  encoder[0]
    (HIDDEN_DIM, HIDDEN_DIM * 2),       # 1  encoder[3]
    (HIDDEN_DIM * 2, HIDDEN_DIM),       # 2  encoder[6]
    (HIDDEN_DIM, LATENT_DIM),           # 3  fc_mu
    (HIDDEN_DIM, LATENT_DIM),           # 4  fc_logvar
    (LATENT_DIM, HIDDEN_DIM),           # 5  decoder_input[0]
    (HIDDEN_DIM, HIDDEN_DIM * 2),       # 6  decoder_input[3]
    (HIDDEN_DIM * 2, HIDDEN_DIM),       # 7  decoder_input[6]
    (HIDDEN_DIM, INPUT_DIM - 2),        # 8  decoder_input[9]
    (LATENT_DIM + 2, HIDDEN_DIM),       # 9  decoder_sdf[0]
    (HIDDEN_DIM, HIDDEN_DIM * 2),       # 10 decoder_sdf[3]
    (HIDDEN_DIM * 2, HIDDEN_DIM * 4),   # 11 decoder_sdf[6]
    (HIDDEN_DIM * 4, HIDDEN_DIM * 2),   # 12 decoder_sdf[9]
    (HIDDEN_DIM * 2, HIDDEN_DIM),       # 13 decoder_sdf[12]
    (HIDDEN_DIM, 1),                    # 14 decoder_sdf[15]
    (TAU_LATENT_DIM, 1),                # 15 decoder_tau
]
NUM_LAYERS = len(LAYER_DIMS)

# Packed-weight slot indices (each a zero-padded 128x128 weight + 128 bias).
# decoder_tau is folded into W_MUVAR; decoder_sdf[6]+decoder_input[6] live in
# the separate fused (128,256) weight (w_big).
(W_ENC0, W_ENC1, W_ENC2, W_MUVAR,
 W_D95, W_D106, W_D12, W_D13, W_FIN) = range(9)
NUM_W = 9


def init_params(key):
    """Xavier-uniform weights (PyTorch stores (out,in); we keep (in,out)), zero biases."""
    ws, bs = [], []
    keys = jax.random.split(key, NUM_LAYERS)
    for i, (fan_in, fan_out) in enumerate(LAYER_DIMS):
        bound = (6.0 / (fan_in + fan_out)) ** 0.5
        w_t = jax.random.uniform(keys[i], (fan_out, fan_in), jnp.float32,
                                 minval=-bound, maxval=bound)   # torch layout
        ws.append(w_t.T)                                        # (in, out)
        bs.append(jnp.zeros((fan_out,), jnp.float32))
    return ws, bs


def pack_params(ws, bs):
    """Fuse parallel/sequential layers, fold eval-BatchNorm scale, zero-pad, cast to bf16."""
    w = [jnp.zeros((F, F), jnp.float32) for _ in range(NUM_W)]
    b = [jnp.zeros((F,), jnp.float32) for _ in range(NUM_W)]
    w_big = jnp.zeros((F, 2 * F), jnp.float32)
    b_big = jnp.zeros((2 * F,), jnp.float32)
    s = INV_STD

    def put(slot, layer, row0, col0, scale):
        fi, fo = LAYER_DIMS[layer]
        w[slot] = w[slot].at[row0:row0 + fi, col0:col0 + fo].set(ws[layer] * scale)
        b[slot] = b[slot].at[col0:col0 + fo].set(bs[layer] * scale)

    # encoder (BN folded)
    put(W_ENC0, 0, 0, 0, s)
    put(W_ENC1, 1, 0, 0, s)
    put(W_ENC2, 2, 0, 0, s)
    # fc_mu (cols 0-1) + fc_logvar (cols 2-3), no BN
    put(W_MUVAR, 3, 0, LANE_MU, 1.0)
    put(W_MUVAR, 4, 0, LANE_LOGVAR, 1.0)
    # decoder_tau composed with fc_mu (eval mode: z == mu, purely linear path)
    w_tau = ws[3][:, :TAU_LATENT_DIM] @ ws[15]           # (hidden, 1)
    b_tau = bs[3][:TAU_LATENT_DIM] @ ws[15] + bs[15]     # (1,)
    w[W_MUVAR] = w[W_MUVAR].at[0:HIDDEN_DIM, LANE_TAU:LANE_TAU + 1].set(w_tau)
    b[W_MUVAR] = b[W_MUVAR].at[LANE_TAU:LANE_TAU + 1].set(b_tau)
    # decoder_sdf[0] (rows 0-3 = [z,qp], cols 0-31) + decoder_input[0] (rows 0-1 = z, cols 32-63)
    put(W_D95, 9, 0, 0, s)
    put(W_D95, 5, 0, HIDDEN_DIM, s)
    # block-diag: decoder_sdf[3] (rows 0-31 -> cols 0-63) + decoder_input[3] (rows 32-63 -> cols 64-127)
    put(W_D106, 10, 0, 0, s)
    put(W_D106, 6, HIDDEN_DIM, 2 * HIDDEN_DIM, s)
    # decoder_sdf[9], decoder_sdf[12]
    put(W_D12, 12, 0, 0, s)
    put(W_D13, 13, 0, 0, s)
    # final: decoder_sdf[15] (rows 0-31 -> lane 5) + decoder_input[9] (rows 32-63 -> lanes 6-7)
    put(W_FIN, 14, 0, LANE_SDF, 1.0)
    put(W_FIN, 8, HIDDEN_DIM, LANE_XREC, 1.0)

    # fused 256-wide weight: decoder_sdf[6] (rows 0-63 -> cols 0-127)
    #                      + decoder_input[6] (rows 64-127 -> cols 128+32 .. 128+63)
    fi, fo = LAYER_DIMS[11]
    w_big = w_big.at[0:fi, 0:fo].set(ws[11] * s)
    b_big = b_big.at[0:fo].set(bs[11] * s)
    fi, fo = LAYER_DIMS[7]
    r0, c0 = 2 * HIDDEN_DIM, F + HIDDEN_DIM
    w_big = w_big.at[r0:r0 + fi, c0:c0 + fo].set(ws[7] * s)
    b_big = b_big.at[c0:c0 + fo].set(bs[7] * s)

    w_stack = jnp.stack(w).astype(jnp.bfloat16)   # (NUM_W, F, F) bf16 (MXU operand)
    b_stack = jnp.stack(b)[:, None, :]            # (NUM_W, 1, F) f32 (VPU add)
    w_big = w_big.astype(jnp.bfloat16)            # (F, 2F) bf16
    b_big = b_big[None, :]                        # (1, 2F) f32
    return w_stack, b_stack, w_big, b_big


def _vae_kernel(x_ref, w_ref, b_ref, wbig_ref, bbig_ref, out_ref, pin_ref):
    bf16 = jnp.bfloat16

    def lin(h, i):
        # bf16 x bf16 MXU matmul with f32 accumulation; bias add stays f32 (VPU).
        return (jnp.dot(h.astype(bf16), w_ref[i], preferred_element_type=jnp.float32)
                + b_ref[i])

    def act(h):                               # LeakyReLU(0.2); BN scale already folded
        return jnp.where(h >= 0.0, h, LEAKY * h)

    # Expand the packed (TB, 8) input to lane width 128 via the VMEM scratch:
    # lanes 0-1 encoder input | lanes 2-3 query points | lanes 4-127 zero.
    pin_ref[...] = jnp.zeros_like(pin_ref)
    pin_ref[:, 0:PACK_W] = x_ref[...]
    pin = pin_ref[...]

    lane = jax.lax.broadcasted_iota(jnp.int32, pin.shape, 1)   # hoisted, single instance
    z_mask = lane < LATENT_DIM

    # ---- encoder ----
    h = act(lin(pin, W_ENC0))                 # qp lanes hit zero-padded weight rows
    h = act(lin(h, W_ENC1))
    h = act(lin(h, W_ENC2))
    ml = lin(h, W_MUVAR)                      # mu 0-1 | logvar 2-3 | tau 4 (folded)

    # ---- eval-mode reparameterize (z = mu) + concat([z, query_points]) ----
    sdf_in = jnp.where(z_mask, ml, pin)       # lanes 0-1 z | lanes 2-3 qp | rest 0

    # ---- fused decoder_sdf / decoder_input chains ----
    h1 = act(lin(sdf_in, W_D95))              # sdf h1 lanes 0-31 | rec h1 lanes 32-63
    h2 = act(lin(h1, W_D106))                 # sdf h2 lanes 0-63 | rec h2 lanes 64-127
    h3 = act(jnp.dot(h2.astype(bf16), wbig_ref[...],
                     preferred_element_type=jnp.float32) + bbig_ref[...])
    h3s = h3[:, :F]                           # sdf h3 lanes 0-127
    h3x = h3[:, F:]                           # rec h3 lanes 32-63 (of this 128-slice)
    h4 = act(lin(h3s, W_D12))                 # sdf h4 lanes 0-63
    h5 = act(lin(h4, W_D13)) + h3x            # sdf h5 lanes 0-31 | rec h3 lanes 32-63

    # single lane-dense packed output: mu|logvar|tau|sdf|xrec in lanes 0-7
    out_ref[...] = ml + lin(h5, W_FIN)


def _round_up(n, m):
    return ((n + m - 1) // m) * m


@functools.partial(jax.jit, static_argnames=("tile_b",))
def vae_forward(x, w_stack, b_stack, w_big, b_big, tile_b=1024):
    """x: (B, INPUT_DIM) float32.  Returns dict matching VAE.forward(x,
    reconstruction=True, Heaviside=True) in eval mode."""
    B = x.shape[0]
    TB = min(tile_b, _round_up(B, 8))
    # If the whole batch fits in one tile, still split into >=2 grid steps so
    # the "parallel" batch axis shards across both v7x TensorCores.
    if _round_up(B, 8) <= tile_b and B > 8:
        TB = _round_up((B + 1) // 2, 8)
    Bp = _round_up(B, TB)

    # packed (Bp, 8) input: lanes 0-1 = x[:,2:4] (encoder input), lanes 2-3 = x[:,:2] (qp)
    x_perm = jnp.concatenate([x[:, 2:], x[:, :2]], axis=1)     # (B, 4)
    pin = jnp.zeros((Bp, PACK_W), jnp.float32).at[:B, :INPUT_DIM].set(x_perm)

    out = pl.pallas_call(
        _vae_kernel,
        out_shape=jax.ShapeDtypeStruct((Bp, F), jnp.float32),
        grid_spec=pltpu.PrefetchScalarGridSpec(
            num_scalar_prefetch=0,
            grid=(Bp // TB,),
            in_specs=[
                pl.BlockSpec((TB, PACK_W), lambda i: (i, 0)),       # activations: tiled
                pl.BlockSpec((NUM_W, F, F), lambda i: (0, 0, 0)),   # weights: resident
                pl.BlockSpec((NUM_W, 1, F), lambda i: (0, 0, 0)),   # biases: resident
                pl.BlockSpec((F, 2 * F), lambda i: (0, 0)),         # fused 256-wide weight
                pl.BlockSpec((1, 2 * F), lambda i: (0, 0)),         # fused bias
            ],
            out_specs=pl.BlockSpec((TB, F), lambda i: (i, 0)),
            scratch_shapes=[pltpu.VMEM((TB, F), jnp.float32)],      # 128-lane input expansion
        ),
        compiler_params=pltpu.CompilerParams(
            dimension_semantics=("parallel",),
            vmem_limit_bytes=32 * 1024 * 1024,
        ),
    )(pin, w_stack, b_stack, w_big, b_big)

    out = out[:B]
    mu = out[:, LANE_MU:LANE_MU + LATENT_DIM]
    return {
        "tau_pred": out[:, LANE_TAU:LANE_TAU + 1],
        "z": mu,                                          # eval mode: z == mu
        "mu": mu,
        "log_var": out[:, LANE_LOGVAR:LANE_LOGVAR + LATENT_DIM],
        "sdf_pred": out[:, LANE_SDF:LANE_SDF + 1],
        "x_reconstructed": out[:, LANE_XREC:LANE_XREC + (INPUT_DIM - 2)],
    }


def reference_forward(x, ws, bs):
    """Pure-JAX f32 reference matching the PyTorch eval-mode forward."""
    def lin(h, i):
        return h @ ws[i] + bs[i]

    def bn_act(h):
        h = h / jnp.sqrt(1.0 + BN_EPS)
        return jnp.where(h >= 0.0, h, LEAKY * h)

    qp = x[:, :2]
    h = bn_act(lin(x[:, 2:], 0))
    h = bn_act(lin(h, 1))
    h = bn_act(lin(h, 2))
    mu = lin(h, 3)
    log_var = lin(h, 4)
    z = mu
    tau = z[:, :TAU_LATENT_DIM] @ ws[15] + bs[15]
    sdf_in = jnp.concatenate([z, qp], axis=1)
    h = bn_act(lin(sdf_in, 9))
    h = bn_act(lin(h, 10))
    h = bn_act(lin(h, 11))
    h = bn_act(lin(h, 12))
    h = bn_act(lin(h, 13))
    sdf = lin(h, 14)
    h = bn_act(lin(z, 5))
    h = bn_act(lin(h, 6))
    h = bn_act(lin(h, 7))
    xrec = lin(h, 8)
    return {"tau_pred": tau, "z": z, "mu": mu, "log_var": log_var,
            "sdf_pred": sdf, "x_reconstructed": xrec}


if __name__ == "__main__":
    key = jax.random.PRNGKey(0)
    k_param, k_x1, k_x2 = jax.random.split(key, 3)
    ws, bs = init_params(k_param)
    w_stack, b_stack, w_big, b_big = pack_params(ws, bs)

    names = ("mu", "log_var", "z", "tau_pred", "sdf_pred", "x_reconstructed")
    # bf16 MXU operands -> looser tolerances than the f32 reference.
    ATOL = RTOL = 2e-2

    # small batch; auto-split into 2 grid steps (keeps both v7x TCs busy)
    x = jax.random.normal(k_x1, (16, INPUT_DIM), jnp.float32)
    out = jax.block_until_ready(vae_forward(x, w_stack, b_stack, w_big, b_big))
    ref = reference_forward(x, ws, bs)
    for name in names:
        assert jnp.allclose(out[name], ref[name], atol=ATOL, rtol=RTOL), name

    # larger ragged batch exercising the batch grid (3 tiles of 256 rows)
    x2 = jax.random.normal(k_x2, (600, INPUT_DIM), jnp.float32)
    out2 = jax.block_until_ready(
        vae_forward(x2, w_stack, b_stack, w_big, b_big, tile_b=256))
    ref2 = reference_forward(x2, ws, bs)
    for name in names:
        assert jnp.allclose(out2[name], ref2[name], atol=ATOL, rtol=RTOL), name

    print("KERNEL_OK")
</pallas_src>

<mosaic_0001>
module attributes {stable_mosaic.version = 11 : i64} {
  func.func @_vae_kernel(%arg0: i32, %arg1: memref<8x8xf32, #tpu.memory_space<vmem>>, %arg2: memref<9x128x128xbf16, #tpu.memory_space<vmem>>, %arg3: memref<9x1x128xf32, #tpu.memory_space<vmem>>, %arg4: memref<128x256xbf16, #tpu.memory_space<vmem>>, %arg5: memref<1x256xf32, #tpu.memory_space<vmem>>, %arg6: memref<8x128xf32, #tpu.memory_space<vmem>>, %arg7: memref<8x128xf32, #tpu.memory_space<vmem>>) attributes {dimension_semantics = [#tpu.dimension_semantics<parallel>], iteration_bounds = array<i64: 2>, scalar_prefetch = 0 : i64, scratch_operands = 1 : i64, tpu.core_type = #tpu.core_type<tc>, window_params = [{transform_indices = @transform_0, window_bounds = array<i64: 8, 8>}, {pipeline_mode = #tpu.pipeline_mode<synchronous>, transform_indices = @transform_1, window_bounds = array<i64: 9, 128, 128>}, {pipeline_mode = #tpu.pipeline_mode<synchronous>, transform_indices = @transform_2, window_bounds = array<i64: 9, 1, 128>}, {pipeline_mode = #tpu.pipeline_mode<synchronous>, transform_indices = @transform_3, window_bounds = array<i64: 128, 256>}, {pipeline_mode = #tpu.pipeline_mode<synchronous>, transform_indices = @transform_4, window_bounds = array<i64: 1, 256>}, {transform_indices = @transform_5, window_bounds = array<i64: 8, 128>}]} {
    %cst = arith.constant 0.000000e+00 : f32
    %0 = vector.broadcast %cst : f32 to vector<8x128xf32>
    %c0 = arith.constant 0 : index
    %c0_0 = arith.constant 0 : index
    %1 = vector.load %arg7[%c0, %c0_0] : memref<8x128xf32, #tpu.memory_space<vmem>>, vector<8x128xf32>
    tpu.vector_store %arg7[%c0, %c0_0], %0 {strides = array<i32>} : memref<8x128xf32, #tpu.memory_space<vmem>>, vector<8x128xf32>,
    %c0_1 = arith.constant 0 : index
    %c0_2 = arith.constant 0 : index
    %2 = vector.load %arg1[%c0_1, %c0_2] : memref<8x8xf32, #tpu.memory_space<vmem>>, vector<8x8xf32>
    %c0_3 = arith.constant 0 : index
    %c0_4 = arith.constant 0 : index
    %3 = vector.load %arg7[%c0_3, %c0_4] : memref<8x128xf32, #tpu.memory_space<vmem>>, vector<8x8xf32>
    tpu.vector_store %arg7[%c0_3, %c0_4], %2 {strides = array<i32>} : memref<8x128xf32, #tpu.memory_space<vmem>>, vector<8x8xf32>,
    %c0_5 = arith.constant 0 : index
    %c0_6 = arith.constant 0 : index
    %4 = vector.load %arg7[%c0_5, %c0_6] : memref<8x128xf32, #tpu.memory_space<vmem>>, vector<8x128xf32>
    %5 = tpu.iota {dimensions = array<i32: 1>} : vector<8x128xi32>
    %c2_i32 = arith.constant 2 : i32
    %6 = vector.broadcast %c2_i32 : i32 to vector<8x128xi32>
    %7 = arith.cmpi slt, %5, %6 : vector<8x128xi32>
    %8 = arith.truncf %4 : vector<8x128xf32> to vector<8x128xbf16>
    %c0_7 = arith.constant 0 : index
    %c0_8 = arith.constant 0 : index
    %c0_9 = arith.constant 0 : index
    %9 = vector.load %arg2[%c0_7, %c0_8, %c0_9] : memref<9x128x128xbf16, #tpu.memory_space<vmem>>, vector<1x128x128xbf16>
    %10 = vector.shape_cast %9 : vector<1x128x128xbf16> to vector<128x128xbf16>
    %cst_10 = arith.constant dense<0.000000e+00> : vector<8x128xf32>
    %11 = tpu.matmul %8, %10, %cst_10 {dimension_numbers = #tpu.dot_dimension_numbers<[1], [0], [0], [1], [0, 0, 1, 1], [], []>} : vector<8x128xbf16>, vector<128x128xbf16>, vector<8x128xf32> -> vector<8x128xf32>
    %c0_11 = arith.constant 0 : index
    %c0_12 = arith.constant 0 : index
    %c0_13 = arith.constant 0 : index
    %12 = vector.load %arg3[%c0_11, %c0_12, %c0_13] : memref<9x1x128xf32, #tpu.memory_space<vmem>>, vector<1x1x128xf32>
    %13 = vector.shape_cast %12 : vector<1x1x128xf32> to vector<1x128xf32>
    %14 = vector.broadcast %13 : vector<1x128xf32> to vector<8x128xf32>
    %15 = arith.addf %11, %14 : vector<8x128xf32>
    %cst_14 = arith.constant 0.000000e+00 : f32
    %16 = vector.broadcast %cst_14 : f32 to vector<8x128xf32>
    %17 = arith.cmpf oge, %15, %16 : vector<8x128xf32>
    %cst_15 = arith.constant 2.000000e-01 : f32
    %18 = vector.broadcast %cst_15 : f32 to vector<8x128xf32>
    %19 = arith.mulf %18, %15 : vector<8x128xf32>
    %20 = arith.select %17, %15, %19 : vector<8x128xi1>, vector<8x128xf32>
    %21 = arith.truncf %20 : vector<8x128xf32> to vector<8x128xbf16>
    %c1 = arith.constant 1 : index
    %c0_16 = arith.constant 0 : index
    %c0_17 = arith.constant 0 : index
    %22 = vector.load %arg2[%c1, %c0_16, %c0_17] : memref<9x128x128xbf16, #tpu.memory_space<vmem>>, vector<1x128x128xbf16>
    %23 = vector.shape_cast %22 : vector<1x128x128xbf16> to vector<128x128xbf16>
    %cst_18 = arith.constant dense<0.000000e+00> : vector<8x128xf32>
    %24 = tpu.matmul %21, %23, %cst_18 {dimension_numbers = #tpu.dot_dimension_numbers<[1], [0], [0], [1], [0, 0, 1, 1], [], []>} : vector<8x128xbf16>, vector<128x128xbf16>, vector<8x128xf32> -> vector<8x128xf32>
    %c1_19 = arith.constant 1 : index
    %c0_20 = arith.constant 0 : index
    %c0_21 = arith.constant 0 : index
    %25 = vector.load %arg3[%c1_19, %c0_20, %c0_21] : memref<9x1x128xf32, #tpu.memory_space<vmem>>, vector<1x1x128xf32>
    %26 = vector.shape_cast %25 : vector<1x1x128xf32> to vector<1x128xf32>
    %27 = vector.broadcast %26 : vector<1x128xf32> to vector<8x128xf32>
    %28 = arith.addf %24, %27 : vector<8x128xf32>
    %cst_22 = arith.constant 0.000000e+00 : f32
    %29 = vector.broadcast %cst_22 : f32 to vector<8x128xf32>
    %30 = arith.cmpf oge, %28, %29 : vector<8x128xf32>
    %cst_23 = arith.constant 2.000000e-01 : f32
    %31 = vector.broadcast %cst_23 : f32 to vector<8x128xf32>
    %32 = arith.mulf %31, %28 : vector<8x128xf32>
    %33 = arith.select %30, %28, %32 : vector<8x128xi1>, vector<8x128xf32>
    %34 = arith.truncf %33 : vector<8x128xf32> to vector<8x128xbf16>
    %c2 = arith.constant 2 : index
    %c0_24 = arith.constant 0 : index
    %c0_25 = arith.constant 0 : index
    %35 = vector.load %arg2[%c2, %c0_24, %c0_25] : memref<9x128x128xbf16, #tpu.memory_space<vmem>>, vector<1x128x128xbf16>
    %36 = vector.shape_cast %35 : vector<1x128x128xbf16> to vector<128x128xbf16>
    %cst_26 = arith.constant dense<0.000000e+00> : vector<8x128xf32>
    %37 = tpu.matmul %34, %36, %cst_26 {dimension_numbers = #tpu.dot_dimension_numbers<[1], [0], [0], [1], [0, 0, 1, 1], [], []>} : vector<8x128xbf16>, vector<128x128xbf16>, vector<8x128xf32> -> vector<8x128xf32>
    %c2_27 = arith.constant 2 : index
    %c0_28 = arith.constant 0 : index
    %c0_29 = arith.constant 0 : index
    %38 = vector.load %arg3[%c2_27, %c0_28, %c0_29] : memref<9x1x128xf32, #tpu.memory_space<vmem>>, vector<1x1x128xf32>
    %39 = vector.shape_cast %38 : vector<1x1x128xf32> to vector<1x128xf32>
    %40 = vector.broadcast %39 : vector<1x128xf32> to vector<8x128xf32>
    %41 = arith.addf %37, %40 : vector<8x128xf32>
    %cst_30 = arith.constant 0.000000e+00 : f32
    %42 = vector.broadcast %cst_30 : f32 to vector<8x128xf32>
    %43 = arith.cmpf oge, %41, %42 : vector<8x128xf32>
    %cst_31 = arith.constant 2.000000e-01 : f32
    %44 = vector.broadcast %cst_31 : f32 to vector<8x128xf32>
    %45 = arith.mulf %44, %41 : vector<8x128xf32>
    %46 = arith.select %43, %41, %45 : vector<8x128xi1>, vector<8x128xf32>
    %47 = arith.truncf %46 : vector<8x128xf32> to vector<8x128xbf16>
    %c3 = arith.constant 3 : index
    %c0_32 = arith.constant 0 : index
    %c0_33 = arith.constant 0 : index
    %48 = vector.load %arg2[%c3, %c0_32, %c0_33] : memref<9x128x128xbf16, #tpu.memory_space<vmem>>, vector<1x128x128xbf16>
    %49 = vector.shape_cast %48 : vector<1x128x128xbf16> to vector<128x128xbf16>
    %cst_34 = arith.constant dense<0.000000e+00> : vector<8x128xf32>
    %50 = tpu.matmul %47, %49, %cst_34 {dimension_numbers = #tpu.dot_dimension_numbers<[1], [0], [0], [1], [0, 0, 1, 1], [], []>} : vector<8x128xbf16>, vector<128x128xbf16>, vector<8x128xf32> -> vector<8x128xf32>
    %c3_35 = arith.constant 3 : index
    %c0_36 = arith.constant 0 : index
    %c0_37 = arith.constant 0 : index
    %51 = vector.load %arg3[%c3_35, %c0_36, %c0_37] : memref<9x1x128xf32, #tpu.memory_space<vmem>>, vector<1x1x128xf32>
    %52 = vector.shape_cast %51 : vector<1x1x128xf32> to vector<1x128xf32>
    %53 = vector.broadcast %52 : vector<1x128xf32> to vector<8x128xf32>
    %54 = arith.addf %50, %53 : vector<8x128xf32>
    %55 = arith.select %7, %54, %4 : vector<8x128xi1>, vector<8x128xf32>
    %56 = arith.truncf %55 : vector<8x128xf32> to vector<8x128xbf16>
    %c4 = arith.constant 4 : index
    %c0_38 = arith.constant 0 : index
    %c0_39 = arith.constant 0 : index
    %57 = vector.load %arg2[%c4, %c0_38, %c0_39] : memref<9x128x128xbf16, #tpu.memory_space<vmem>>, vector<1x128x128xbf16>
    %58 = vector.shape_cast %57 : vector<1x128x128xbf16> to vector<128x128xbf16>
    %cst_40 = arith.constant dense<0.000000e+00> : vector<8x128xf32>
    %59 = tpu.matmul %56, %58, %cst_40 {dimension_numbers = #tpu.dot_dimension_numbers<[1], [0], [0], [1], [0, 0, 1, 1], [], []>} : vector<8x128xbf16>, vector<128x128xbf16>, vector<8x128xf32> -> vector<8x128xf32>
    %c4_41 = arith.constant 4 : index
    %c0_42 = arith.constant 0 : index
    %c0_43 = arith.constant 0 : index
    %60 = vector.load %arg3[%c4_41, %c0_42, %c0_43] : memref<9x1x128xf32, #tpu.memory_space<vmem>>, vector<1x1x128xf32>
    %61 = vector.shape_cast %60 : vector<1x1x128xf32> to vector<1x128xf32>
    %62 = vector.broadcast %61 : vector<1x128xf32> to vector<8x128xf32>
    %63 = arith.addf %59, %62 : vector<8x128xf32>
    %cst_44 = arith.constant 0.000000e+00 : f32
    %64 = vector.broadcast %cst_44 : f32 to vector<8x128xf32>
    %65 = arith.cmpf oge, %63, %64 : vector<8x128xf32>
    %cst_45 = arith.constant 2.000000e-01 : f32
    %66 = vector.broadcast %cst_45 : f32 to vector<8x128xf32>
    %67 = arith.mulf %66, %63 : vector<8x128xf32>
    %68 = arith.select %65, %63, %67 : vector<8x128xi1>, vector<8x128xf32>
    %69 = arith.truncf %68 : vector<8x128xf32> to vector<8x128xbf16>
    %c5 = arith.constant 5 : index
    %c0_46 = arith.constant 0 : index
    %c0_47 = arith.constant 0 : index
    %70 = vector.load %arg2[%c5, %c0_46, %c0_47] : memref<9x128x128xbf16, #tpu.memory_space<vmem>>, vector<1x128x128xbf16>
    %71 = vector.shape_cast %70 : vector<1x128x128xbf16> to vector<128x128xbf16>
    %cst_48 = arith.constant dense<0.000000e+00> : vector<8x128xf32>
    %72 = tpu.matmul %69, %71, %cst_48 {dimension_numbers = #tpu.dot_dimension_numbers<[1], [0], [0], [1], [0, 0, 1, 1], [], []>} : vector<8x128xbf16>, vector<128x128xbf16>, vector<8x128xf32> -> vector<8x128xf32>
    %c5_49 = arith.constant 5 : index
    %c0_50 = arith.constant 0 : index
    %c0_51 = arith.constant 0 : index
    %73 = vector.load %arg3[%c5_49, %c0_50, %c0_51] : memref<9x1x128xf32, #tpu.memory_space<vmem>>, vector<1x1x128xf32>
    %74 = vector.shape_cast %73 : vector<1x1x128xf32> to vector<1x128xf32>
    %75 = vector.broadcast %74 : vector<1x128xf32> to vector<8x128xf32>
    %76 = arith.addf %72, %75 : vector<8x128xf32>
    %cst_52 = arith.constant 0.000000e+00 : f32
    %77 = vector.broadcast %cst_52 : f32 to vector<8x128xf32>
    %78 = arith.cmpf oge, %76, %77 : vector<8x128xf32>
    %cst_53 = arith.constant 2.000000e-01 : f32
    %79 = vector.broadcast %cst_53 : f32 to vector<8x128xf32>
    %80 = arith.mulf %79, %76 : vector<8x128xf32>
    %81 = arith.select %78, %76, %80 : vector<8x128xi1>, vector<8x128xf32>
    %82 = arith.truncf %81 : vector<8x128xf32> to vector<8x128xbf16>
    %c0_54 = arith.constant 0 : index
    %c0_55 = arith.constant 0 : index
    %83 = vector.load %arg4[%c0_54, %c0_55] : memref<128x256xbf16, #tpu.memory_space<vmem>>, vector<128x256xbf16>
    %cst_56 = arith.constant dense<0.000000e+00> : vector<8x256xf32>
    %84 = tpu.matmul %82, %83, %cst_56 {dimension_numbers = #tpu.dot_dimension_numbers<[1], [0], [0], [1], [0, 0, 1, 1], [], []>} : vector<8x128xbf16>, vector<128x256xbf16>, vector<8x256xf32> -> vector<8x256xf32>
    %c0_57 = arith.constant 0 : index
    %c0_58 = arith.constant 0 : index
    %85 = vector.load %arg5[%c0_57, %c0_58] : memref<1x256xf32, #tpu.memory_space<vmem>>, vector<1x256xf32>
    %86 = vector.broadcast %85 : vector<1x256xf32> to vector<8x256xf32>
    %87 = arith.addf %84, %86 : vector<8x256xf32>
    %cst_59 = arith.constant 0.000000e+00 : f32
    %88 = vector.broadcast %cst_59 : f32 to vector<8x256xf32>
    %89 = arith.cmpf oge, %87, %88 : vector<8x256xf32>
    %cst_60 = arith.constant 2.000000e-01 : f32
    %90 = vector.broadcast %cst_60 : f32 to vector<8x256xf32>
    %91 = arith.mulf %90, %87 : vector<8x256xf32>
    %92 = arith.select %89, %87, %91 : vector<8x256xi1>, vector<8x256xf32>
    %93 = vector.extract_strided_slice %92 {offsets = [0, 0], sizes = [8, 128], strides = [1, 1]} : vector<8x256xf32> to vector<8x128xf32>
    %94 = vector.extract_strided_slice %92 {offsets = [0, 128], sizes = [8, 128], strides = [1, 1]} : vector<8x256xf32> to vector<8x128xf32>
    %95 = arith.truncf %93 : vector<8x128xf32> to vector<8x128xbf16>
    %c6 = arith.constant 6 : index
    %c0_61 = arith.constant 0 : index
    %c0_62 = arith.constant 0 : index
    %96 = vector.load %arg2[%c6, %c0_61, %c0_62] : memref<9x128x128xbf16, #tpu.memory_space<vmem>>, vector<1x128x128xbf16>
    %97 = vector.shape_cast %96 : vector<1x128x128xbf16> to vector<128x128xbf16>
    %cst_63 = arith.constant dense<0.000000e+00> : vector<8x128xf32>
    %98 = tpu.matmul %95, %97, %cst_63 {dimension_numbers = #tpu.dot_dimension_numbers<[1], [0], [0], [1], [0, 0, 1, 1], [], []>} : vector<8x128xbf16>, vector<128x128xbf16>, vector<8x128xf32> -> vector<8x128xf32>
    %c6_64 = arith.constant 6 : index
    %c0_65 = arith.constant 0 : index
    %c0_66 = arith.constant 0 : index
    %99 = vector.load %arg3[%c6_64, %c0_65, %c0_66] : memref<9x1x128xf32, #tpu.memory_space<vmem>>, vector<1x1x128xf32>
    %100 = vector.shape_cast %99 : vector<1x1x128xf32> to vector<1x128xf32>
    %101 = vector.broadcast %100 : vector<1x128xf32> to vector<8x128xf32>
    %102 = arith.addf %98, %101 : vector<8x128xf32>
    %cst_67 = arith.constant 0.000000e+00 : f32
    %103 = vector.broadcast %cst_67 : f32 to vector<8x128xf32>
    %104 = arith.cmpf oge, %102, %103 : vector<8x128xf32>
    %cst_68 = arith.constant 2.000000e-01 : f32
    %105 = vector.broadcast %cst_68 : f32 to vector<8x128xf32>
    %106 = arith.mulf %105, %102 : vector<8x128xf32>
    %107 = arith.select %104, %102, %106 : vector<8x128xi1>, vector<8x128xf32>
    %108 = arith.truncf %107 : vector<8x128xf32> to vector<8x128xbf16>
    %c7 = arith.constant 7 : index
    %c0_69 = arith.constant 0 : index
    %c0_70 = arith.constant 0 : index
    %109 = vector.load %arg2[%c7, %c0_69, %c0_70] : memref<9x128x128xbf16, #tpu.memory_space<vmem>>, vector<1x128x128xbf16>
    %110 = vector.shape_cast %109 : vector<1x128x128xbf16> to vector<128x128xbf16>
    %cst_71 = arith.constant dense<0.000000e+00> : vector<8x128xf32>
    %111 = tpu.matmul %108, %110, %cst_71 {dimension_numbers = #tpu.dot_dimension_numbers<[1], [0], [0], [1], [0, 0, 1, 1], [], []>} : vector<8x128xbf16>, vector<128x128xbf16>, vector<8x128xf32> -> vector<8x128xf32>
    %c7_72 = arith.constant 7 : index
    %c0_73 = arith.constant 0 : index
    %c0_74 = arith.constant 0 : index
    %112 = vector.load %arg3[%c7_72, %c0_73, %c0_74] : memref<9x1x128xf32, #tpu.memory_space<vmem>>, vector<1x1x128xf32>
    %113 = vector.shape_cast %112 : vector<1x1x128xf32> to vector<1x128xf32>
    %114 = vector.broadcast %113 : vector<1x128xf32> to vector<8x128xf32>
    %115 = arith.addf %111, %114 : vector<8x128xf32>
    %cst_75 = arith.constant 0.000000e+00 : f32
    %116 = vector.broadcast %cst_75 : f32 to vector<8x128xf32>
    %117 = arith.cmpf oge, %115, %116 : vector<8x128xf32>
    %cst_76 = arith.constant 2.000000e-01 : f32
    %118 = vector.broadcast %cst_76 : f32 to vector<8x128xf32>
    %119 = arith.mulf %118, %115 : vector<8x128xf32>
    %120 = arith.select %117, %115, %119 : vector<8x128xi1>, vector<8x128xf32>
    %121 = arith.addf %120, %94 : vector<8x128xf32>
    %122 = arith.truncf %121 : vector<8x128xf32> to vector<8x128xbf16>
    %c8 = arith.constant 8 : index
    %c0_77 = arith.constant 0 : index
    %c0_78 = arith.constant 0 : index
    %123 = vector.load %arg2[%c8, %c0_77, %c0_78] : memref<9x128x128xbf16, #tpu.memory_space<vmem>>, vector<1x128x128xbf16>
    %124 = vector.shape_cast %123 : vector<1x128x128xbf16> to vector<128x128xbf16>
    %cst_79 = arith.constant dense<0.000000e+00> : vector<8x128xf32>
    %125 = tpu.matmul %122, %124, %cst_79 {dimension_numbers = #tpu.dot_dimension_numbers<[1], [0], [0], [1], [0, 0, 1, 1], [], []>} : vector<8x128xbf16>, vector<128x128xbf16>, vector<8x128xf32> -> vector<8x128xf32>
    %c8_80 = arith.constant 8 : index
    %c0_81 = arith.constant 0 : index
    %c0_82 = arith.constant 0 : index
    %126 = vector.load %arg3[%c8_80, %c0_81, %c0_82] : memref<9x1x128xf32, #tpu.memory_space<vmem>>, vector<1x1x128xf32>
    %127 = vector.shape_cast %126 : vector<1x1x128xf32> to vector<1x128xf32>
    %128 = vector.broadcast %127 : vector<1x128xf32> to vector<8x128xf32>
    %129 = arith.addf %125, %128 : vector<8x128xf32>
    %130 = arith.addf %54, %129 : vector<8x128xf32>
    %c0_83 = arith.constant 0 : index
    %c0_84 = arith.constant 0 : index
    %131 = vector.load %arg6[%c0_83, %c0_84] : memref<8x128xf32, #tpu.memory_space<vmem>>, vector<8x128xf32>
    tpu.vector_store %arg6[%c0_83, %c0_84], %130 {strides = array<i32>} : memref<8x128xf32, #tpu.memory_space<vmem>>, vector<8x128xf32>,
    return
  }
  func.func @transform_0(%arg0: i32) -> (i32, i32) {
    %c0_i32 = arith.constant 0 : i32
    %c0_i32_0 = arith.constant 0 : i32
    return %arg0, %c0_i32 : i32, i32
  }
  func.func @transform_1(%arg0: i32) -> (i32, i32, i32) {
    %c0_i32 = arith.constant 0 : i32
    %c0_i32_0 = arith.constant 0 : i32
    %c0_i32_1 = arith.constant 0 : i32
    %c0_i32_2 = arith.constant 0 : i32
    return %c0_i32, %c0_i32_0, %c0_i32_1 : i32, i32, i32
  }
  func.func @transform_2(%arg0: i32) -> (i32, i32, i32) {
    %c0_i32 = arith.constant 0 : i32
    %c0_i32_0 = arith.constant 0 : i32
    %c0_i32_1 = arith.constant 0 : i32
    %c0_i32_2 = arith.constant 0 : i32
    return %c0_i32, %c0_i32_0, %c0_i32_1 : i32, i32, i32
  }
  func.func @transform_3(%arg0: i32) -> (i32, i32) {
    %c0_i32 = arith.constant 0 : i32
    %c0_i32_0 = arith.constant 0 : i32
    %c0_i32_1 = arith.constant 0 : i32
    return %c0_i32, %c0_i32_0 : i32, i32
  }
  func.func @transform_4(%arg0: i32) -> (i32, i32) {
    %c0_i32 = arith.constant 0 : i32
    %c0_i32_0 = arith.constant 0 : i32
    %c0_i32_1 = arith.constant 0 : i32
    return %c0_i32, %c0_i32_0 : i32, i32
  }
  func.func @transform_5(%arg0: i32) -> (i32, i32) {
    %c0_i32 = arith.constant 0 : i32
    %c0_i32_0 = arith.constant 0 : i32
    return %arg0, %c0_i32 : i32, i32
  }
}

</mosaic_0001>

<bundles_post_ra>
// kernel: vae_forward.1
= control target key start
LH: loop header
LB: loop body
LE: loop exit
PB: predicated region body
PF: predicated region fallthrough
CT: control target
= control target key end

     0   :  { %10 = vsyncpa [#allocation4], 0  ;;  %s2393_s0 = inlined_call_operand.vmem [shape: f32[16,8], index: 0, kind: input, shape index: {}]   ;;  %s2394_s1 = inlined_call_operand.hbm [shape: bf16[9,128,128], index: 1, kind: input, shape index: {}]   ;;  %s2395_s2 = inlined_call_operand.vmem [shape: f32[9,1,128], index: 2, kind: input, shape index: {}]   ;;  %s2396_s3 = inlined_call_operand.hbm [shape: bf16[128,256], index: 3, kind: input, shape index: {}]   ;;  %s2397_s4 = inlined_call_operand.vmem [shape: f32[1,256], index: 4, kind: input, shape index: {}]   ;;  %s2398_s5 = inlined_call_operand.vmem [shape: f32[16,128], index: 5, kind: output, shape index: {}]  }
   0x1   :  { %11 = vsyncpa [#allocation6], 0  ;;  %s2161_s18 = smov 0  }
   0x2 LB: > { %s2122_s19 = smov [#allocation3]   ;;  %s2167_s21 = sadd.s32 4294967295, %s2120_s18   ;;  %s2120_s18 = sphi %s2161_s18, %s17_s18  }
   0x3   : > { %s170_s20 = sshll.u32 %s2122_s19, 4  ;;  %p1541_p0 = scmp.ge.s32.totalorder %s2120_s18, 1  ;;  %s171_s20 = int_to_ptr.vmem [resolvable:$true] %s170_s20 }
   0x4   : > { %p158_p1 = scmp.lt.s32.totalorder %s2120_s18, 3  ;;  %p2399_p3 = scmp.eq.s32.totalorder %s2167_s21, 0 }
   0x5   : > { %s2123_s23 = smov [#allocation5]   ;;  %s2050_s28 = scalar_lea.hbm %s2394_s1, 9216 }
   0x6   : > { %p2171_p2 = pnand %p1541_p0, %p158_p1  ;;  %s186_s24 = sshll.u32 %s2123_s23, 4  ;;  %s2184_s24 = int_to_ptr.vmem [resolvable:$true] %s186_s24 }
   0x7   : > { %p2051_p6 = scmp.ne.s32.totalorder %s2394_s1, %s2050_s28  ;;  %p2057_p10 = scmp.lt.u32.totalorder %s2050_s28, %s2394_s1 }
   0x8   : > { %s2401_s22 = scalar_select %p2171_p2, 1, 0 }
   0x9   : > { %p1926_p4 = pneg %p2171_p2 }
   0xb   : > { %p2180_p5 = pnand %p2399_p3, %p1926_p4 }
   0xd   : > { %p2052_p7 = pneg %p2180_p5 }
   0xf   : > { %p2053_p8 = pnand %p2052_p7, %p2051_p6 }
  0x11   : > { %p2054_p9 = pneg %p2053_p8 }
  0x13   : > { %p2059_p11 = pnand %p2057_p10, %p2054_p9 }
  0x15   : > { %2062 = shalt.err (!%p2059_p11)
}
  0x16   : > { %s2063_s8 = scalar_lea.vmem %s171_s20, 9216  ;;  %p2071_p1 = scmp.lt.s32.totalorder %s171_s20, %s171_s20 }
  0x17   : > { %p2064_p12 = scmp.ne.s32.totalorder %s171_s20, %s2063_s8  ;;  %p2072_p4 = scmp.lt.s32.totalorder %s2063_s8, %s2063_s8 }
  0x19   : > { %p2066_p13 = pnand %p2064_p12, %p2052_p7  ;;  %p2073_p3 = por %p2072_p4, %p2071_p1 }
  0x1b   : > { %p2067_p0 = pneg %p2066_p13 }
  0x1d   : > { %p2074_p2 = pnand %p2073_p3, %p2067_p0 }
  0x1f   : > { %2077 = shalt.err (!%p2074_p2)
}
  0x20   : > { %s2124_s9 = smov 64   ;;  %s2125_s10 = smov 4  }
  0x21   : > { %1929 = dma.hbm_to_vmem [thread:$0]  (!%p2180_p5), %s2394_s1, 9216, %s171_s20, [#allocation4], %s2124_s9, %s2124_s9, %s2125_s10  }
  0x22   : > { %s2078_s15 = scalar_lea.hbm %s2396_s3, 2048 }
  0x23   : > { %p2079_p6 = scmp.ne.s32.totalorder %s2396_s3, %s2078_s15  ;;  %p2085_p8 = scmp.lt.u32.totalorder %s2078_s15, %s2396_s3 }
  0x25   : > { %p2081_p2 = pnand %p2079_p6, %p2052_p7 }
  0x27   : > { %p2082_p3 = pneg %p2081_p2 }
  0x29   : > { %p2087_p9 = pnand %p2085_p8, %p2082_p3 }
  0x2b   : > { %2090 = shalt.err (!%p2087_p9)
}
  0x2c   : > { %s2091_s20 = scalar_lea.vmem %s2184_s24, 2048  ;;  %p2099_p13 = scmp.lt.s32.totalorder %s2184_s24, %s2184_s24 }
  0x2d   : > { %p2092_p10 = scmp.ne.s32.totalorder %s2184_s24, %s2091_s20  ;;  %p2100_p0 = scmp.lt.s32.totalorder %s2091_s20, %s2091_s20 }
  0x2f   : > { %p2094_p11 = pnand %p2092_p10, %p2052_p7  ;;  %p2101_p1 = por %p2100_p0, %p2099_p13 }
  0x31   : > { %p2095_p12 = pneg %p2094_p11 }
  0x33   : > { %p2102_p4 = pnand %p2101_p1, %p2095_p12 }
  0x35   : > { %2105 = shalt.err (!%p2102_p4)
}
  0x36   : > { %s2126_s26 = smov 128   ;;  %s2127_s27 = smov 8  }
  0x37   : > { %1932 = dma.hbm_to_vmem [thread:$0]  (!%p2180_p5), %s2396_s3, 2048, %s2184_s24, [#allocation6], %s2126_s26, %s2126_s26, %s2127_s27  }
  0x38   : > { %p2403_p6 = scmp.ne.s32.totalorder %s2401_s22, 0 }
  0x39   : > { %p2404_p7 = scmp.eq.s32.totalorder (!%p2403_p6), %s2167_s21, 0 }
  0x3a   : > { %212 = sbr.rel (%p2403_p6) target bundleno = 2292 (0x8f4), region = 40 }
  0x41   : > { %2111 = dma.done.wait (%p2404_p7), [#allocation4], 9216   ;;  %p2405_p2 = pmov %p2404_p7 }
  0x43   : > { %2113 = vsyncadd (%p2405_p2), [#allocation4], 4294958080  ;;  %p2406_p3 = pmov %p2405_p2 }
  0x44   : > { %p2407_p8 = pmov %p2405_p2 }
  0x45   : > { %2115 = dma.done.wait (%p2406_p3), [#allocation6], 2048  }
  0x46   : > { %2117 = vsyncadd (%p2407_p8), [#allocation6], 4294965248  ;;  %v2128_v0 = vmov 0.0   ;;  %vm2129_vm0 = vmmov 0   ;;  %p242_p5 = scmp.lt.s32.totalorder %s2167_s21, 1  ;;  %v1954_v1 = vld [vmem:[#allocation3] sm:$0xff]  }
  0x47   : > { %1738 = vmatprep.subr.bf16.mxu0 %v2128_v0  ;;  %251 = vst [vmem:[#allocation2] sm:$0xff] %v2128_v0  ;;  %1754 = vmatprep.mubr.msk.bf16.mxu0 %vm2129_vm0, %v2128_v0  ;;  %v1955_v2 = vld [vmem:[#allocation3 + $0x8] sm:$0xff]   ;;  %v1956_v3 = vld [vmem:[#allocation3 + $0x10] sm:$0xff]   ;;  %vm253_vm1 = vcmask 64512   ;;  %v1962_v5 = vld [vmem:[#allocation3 + $0x40] sm:$0xff]  }
  0x48   : > { %1758 = vmatprep.subr.bf16.mxu1 %v2128_v0  ;;  %1774 = vmatprep.mubr.msk.bf16.mxu1 %vm2129_vm0, %v2128_v0  ;;  %s2409_s21 = smov (!%p242_p5, %s2167_s21), 1  ;;  %v1957_v6 = vld [vmem:[#allocation3 + $0x18] sm:$0xff]   ;;  %v1963_v7 = vld [vmem:[#allocation3 + $0x48] sm:$0xff]   ;;  %v1958_v8 = vld [vmem:[#allocation3 + $0x20] sm:$0xff]  }
  0x49   : > { %1739 = vmatpush3.bf16.msra.mxu0 %v1954_v1  ;;  %s1548_s22 = sshll.u32 %s2409_s21, 3  ;;  %1759 = vmatpush3.bf16.msra.mxu1 %v1962_v5  ;;  %v1964_v9 = vld [vmem:[#allocation3 + $0x50] sm:$0xff]   ;;  %v1959_v10 = vld [vmem:[#allocation3 + $0x28] sm:$0xff]   ;;  %v1965_v11 = vld [vmem:[#allocation3 + $0x58] sm:$0xff]  }
  0x4a   : > { %1740 = vmatprep.subr.bf16.mxu0 %v2128_v0  ;;  %s245_s30 = scalar_lea.vmem %s2393_s0, %s1548_s22  ;;  %1760 = vmatprep.subr.bf16.mxu1 %v2128_v0  ;;  %v1960_v12 = vld [vmem:[#allocation3 + $0x30] sm:$0xff]   ;;  %v1966_v13 = vld [vmem:[#allocation3 + $0x60] sm:$0xff]   ;;  %v1961_v14 = vld [vmem:[#allocation3 + $0x38] sm:$0xff]   ;;  %s249_s6 = scalar_lea.vmem %s2398_s5, %s1548_s22 }
  0x4b   : > { %v252_v4 = vld [vmem:[%s245_s30] sm:$0xff]  ;;  %v1967_v16 = vld [vmem:[#allocation3 + $0x68] sm:$0xff]   ;;  %v1968_v18 = vld [vmem:[#allocation3 + $0x70] sm:$0xff]  }
  0x4c   : > { %254 = vst.msk [vmem:[#allocation2] sm:$0xff] %vm253_vm1, %v252_v4  ;;  %v1969_v19 = vld [vmem:[#allocation3 + $0x78] sm:$0xff]   ;;  %v1970_v20 = vld [vmem:[#allocation3 + $0x80] sm:$0xff]   ;;  %v1971_v21 = vld [vmem:[#allocation3 + $0x88] sm:$0xff]  }
  0x4d   : > { %1741 = vmatpush3.bf16.msra.mxu0 %v1955_v2  ;;  %1761 = vmatpush3.bf16.msra.mxu1 %v1963_v7  ;;  %v1972_v22 = vld [vmem:[#allocation3 + $0x90] sm:$0xff]   ;;  %v1973_v23 = vld [vmem:[#allocation3 + $0x98] sm:$0xff]   ;;  %v1974_v24 = vld [vmem:[#allocation3 + $0xa0] sm:$0xff]  }
  0x4e   : > { %1742 = vmatprep.subr.bf16.mxu0 %v2128_v0  ;;  %1762 = vmatprep.subr.bf16.mxu1 %v2128_v0  ;;  %v1975_v25 = vld [vmem:[#allocation3 + $0xa8] sm:$0xff]   ;;  %v1550_v26 = vld [vmem:[%s2395_s2] ss:$0 sm:$0xff]  ;;  %v1976_v35 = vld [vmem:[#allocation3 + $0xb0] sm:$0xff]  }
  0x4f   : > { %v1977_v36 = vld [vmem:[#allocation3 + $0xb8] sm:$0xff]   ;;  %v1978_v37 = vld [vmem:[#allocation3 + $0xc0] sm:$0xff]   ;;  %v1979_v38 = vld [vmem:[#allocation3 + $0xc8] sm:$0xff]  }
  0x50   : > { %v1980_v39 = vld [vmem:[#allocation3 + $0xd0] sm:$0xff]   ;;  %v1981_v40 = vld [vmem:[#allocation3 + $0xd8] sm:$0xff]   ;;  %v1982_v41 = vld [vmem:[#allocation3 + $0xe0] sm:$0xff]  }
  0x51   : > { %1743 = vmatpush3.bf16.msra.mxu0 %v1956_v3  ;;  %1763 = vmatpush3.bf16.msra.mxu1 %v1964_v9  ;;  %v1983_v42 = vld [vmem:[#allocation3 + $0xe8] sm:$0xff]   ;;  %v1560_v43 = vld [vmem:[%s2395_s2 + $0x1] ss:$0 sm:$0xff]  ;;  %v1984_v52 = vld [vmem:[#allocation3 + $0xf0] sm:$0xff]  }
  0x52   : > { %1744 = vmatprep.subr.bf16.mxu0 %v2128_v0  ;;  %1764 = vmatprep.subr.bf16.mxu1 %v2128_v0  ;;  %v1985_v53 = vld [vmem:[#allocation3 + $0xf8] sm:$0xff]   ;;  %v1986_v54 = vld [vmem:[#allocation3 + $0x100] sm:$0xff]   ;;  %v1987_v55 = vld [vmem:[#allocation3 + $0x108] sm:$0xff]  }
  0x53   : > { %v2269_v15 = vld [vmem:[#allocation2] sm:$0xff]  ;;  %v1988_v56 = vld [vmem:[#allocation3 + $0x110] sm:$0xff]   ;;  %v1990_v58 = vld [vmem:[#allocation3 + $0x120] sm:$0xff]  }
  0x54   : > { %v259_v17 = vpack.c.bf16 %v2269_v15, %v2269_v15  ;;  %v1989_v57 = vld [vmem:[#allocation3 + $0x118] sm:$0xff]   ;;  %v1991_v59 = vld [vmem:[#allocation3 + $0x128] sm:$0xff]   ;;  %v1992_v60 = vld [vmem:[#allocation3 + $0x130] sm:$0xff]  }
  0x55   : > { %1745 = vmatpush3.bf16.msra.mxu0 %v1957_v6  ;;  %1765 = vmatpush3.bf16.msra.mxu1 %v1965_v11  ;;  %v1570_v61 = vld [vmem:[%s2395_s2 + $0x2] ss:$0 sm:$0xff]  ;;  %v1995_v9 = vld [vmem:[#allocation3 + $0x148] sm:$0xff]  }
  0x56   : > { %1746 = vmatprep.subr.bf16.mxu0 %v2128_v0  ;;  %1766 = vmatprep.subr.bf16.mxu1 %v2128_v0  ;;  %v1993_v7 = vld [vmem:[#allocation3 + $0x138] sm:$0xff]  }
  0x57   : > { %v1997_v11 = vld [vmem:[#allocation3 + $0x158] sm:$0xff]  }
  0x59   : > { %1747 = vmatpush3.bf16.msra.mxu0 %v1958_v8  ;;  %1767 = vmatpush3.bf16.msra.mxu1 %v1966_v13  ;;  %v1994_v8 = vld [vmem:[#allocation3 + $0x140] sm:$0xff]   ;;  %v1999_v13 = vld [vmem:[#allocation3 + $0x168] sm:$0xff]  }
  0x5a   : > { %1748 = vmatprep.subr.bf16.mxu0 %v2128_v0  ;;  %1768 = vmatprep.subr.bf16.mxu1 %v2128_v0 }
  0x5d   : > { %1749 = vmatpush3.bf16.msra.mxu0 %v1959_v10  ;;  %1769 = vmatpush3.bf16.msra.mxu1 %v1967_v16  ;;  %v1996_v10 = vld [vmem:[#allocation3 + $0x150] sm:$0xff]  }
  0x5e   : > { %1750 = vmatprep.subr.bf16.mxu0 %v2128_v0  ;;  %1770 = vmatprep.subr.bf16.mxu1 %v2128_v0 }
  0x61   : > { %1751 = vmatpush3.bf16.msra.mxu0 %v1960_v12  ;;  %1771 = vmatpush3.bf16.msra.mxu1 %v1968_v18  ;;  %v1998_v12 = vld [vmem:[#allocation3 + $0x160] sm:$0xff]  }
  0x62   : > { %1752 = vmatprep.subr.bf16.mxu0 %v2128_v0  ;;  %1772 = vmatprep.subr.bf16.mxu1 %v2128_v0 }
  0x65   : > { %1753 = vmatpush3.bf16.msra.mxu0 %v1961_v14  ;;  %1773 = vmatpush3.bf16.msra.mxu1 %v1969_v19  ;;  %v256_v14 = vlaneseq }
  0x66   : > { %1778 = vmatprep.subr.bf16.mxu0 %v2128_v0  ;;  %1798 = vmatprep.subr.bf16.mxu1 %v2128_v0 }
  0x67   : > { %v257_v16 = vand.u32 127, %v256_v14 }
  0x68   : > { %1755 = vmatmul.mubr.bf16.vlgmr.msra.gmra.mrb[0].mxu0 %v259_v17  ;;  %v1580_v17 = vld [vmem:[%s2395_s2 + $0x3] ss:$0 sm:$0xff] }
  0x69   : > { %1794 = vmatprep.mubr.msk.bf16.mxu0 %vm2129_vm0, %v2128_v0  ;;  %1779 = vmatpush3.bf16.msra.mxu0 %v1970_v20  ;;  %vm258_vm5 = vcmp.lt.s32.totalorder %v257_v16, 2  ;;  %v974_v16 = vld [vmem:[%s2397_s4] sm:$0x3] }
  0x6a   : > { %1780 = vmatprep.subr.bf16.mxu0 %v2128_v0 }
  0x6d   : > { %1781 = vmatpush3.bf16.msra.mxu0 %v1971_v21 }
  0x6e   : > { %1782 = vmatprep.subr.bf16.mxu0 %v2128_v0 }
  0x71   : > { %1783 = vmatpush3.bf16.msra.mxu0 %v1972_v22 }
  0x72   : > { %1784 = vmatprep.subr.bf16.mxu0 %v2128_v0 }
  0x75   : > { %1785 = vmatpush3.bf16.msra.mxu0 %v1973_v23 }
  0x76   : > { %1786 = vmatprep.subr.bf16.mxu0 %v2128_v0 }
  0x79   : > { %1787 = vmatpush3.bf16.msra.mxu0 %v1974_v24 }
  0x7a   : > { %1788 = vmatprep.subr.bf16.mxu0 %v2128_v0 }
  0x7d   : > { %1789 = vmatpush3.bf16.msra.mxu0 %v1975_v25  ;;  %v2000_v25 = vld [vmem:[#allocation3 + $0x170] sm:$0xff]  }
  0x7e   : > { %1790 = vmatprep.subr.bf16.mxu0 %v2128_v0 }
  0x81   : > { %1791 = vmatpush3.bf16.msra.mxu0 %v1976_v35  ;;  %v2014_v35 = vld [vmem:[#allocation5 + $0x40] ss:$8 sps:$4 sm:$0xff]  }
  0x82   : > { %1792 = vmatprep.subr.bf16.mxu0 %v2128_v0 }
  0x85   : > { %1793 = vmatpush3.bf16.msra.mxu0 %v1977_v36  ;;  %v2019_v36 = vld [vmem:[#allocation5 + $0x54] ss:$8 sps:$4 sm:$0xff]  }
  0x86   : > { %1818 = vmatprep.subr.bf16.mxu0 %v2128_v0 }
 0x13b   : > { %v365_v27 = vpop.f32.mrb[0].mxu0 }
 0x13c   : > { %v366_v28 = vadd.f32 %v1550_v26, %v365_v27  ;;  %v1756_v29 = vpop.f32.mrb[1].mxu0  ;;  %v2001_v26 = vld [vmem:[#allocation3 + $0x178] sm:$0xff]   ;;  %v2002_v27 = vld [vmem:[#allocation5] ss:$8 sps:$4 sm:$0xff]  }
 0x13d   : > { %v368_v30 = vpop.f32.mrb[2].mxu0  ;;  %v2007_v29 = vld [vmem:[#allocation5 + $0x14] ss:$8 sps:$4 sm:$0xff]  }
 0x13e   : > { %vm371_vm2 = vcmp.ge.f32.partialorder %v366_v28, 0.0  ;;  %v372_v31 = vmul.f32 0.2, %v366_v28  ;;  %v1757_v32 = vpop.f32.mrb[3].mxu0  ;;  %v2005_v30 = vld [vmem:[#allocation5 + $0x10] ss:$8 sps:$4 sm:$0xff]  }
 0x13f   : > { %v2013_v32 = vld [vmem:[#allocation5 + $0x34] ss:$8 sps:$4 sm:$0xff]  }
 0x140   : > { %v373_v33 = vsel %vm371_vm2, %v366_v28, %v372_v31  ;;  %v2004_v28 = vld [vmem:[#allocation5 + $0x4] ss:$8 sps:$4 sm:$0xff]  }
 0x141   : > { %v374_v34 = vpack.c.bf16 %v373_v33, %v373_v33  ;;  %v2010_v31 = vld [vmem:[#allocation5 + $0x24] ss:$8 sps:$4 sm:$0xff]   ;;  %v2011_v33 = vld [vmem:[#allocation5 + $0x30] ss:$8 sps:$4 sm:$0xff]  }
 0x143   : > { %1775 = vmatmul.mubr.bf16.vlgmr.msra.gmra.mrb[0].mxu1 %v374_v34  ;;  %v2016_v34 = vld [vmem:[#allocation5 + $0x44] ss:$8 sps:$4 sm:$0xff]  }
 0x144   : > { %1814 = vmatprep.mubr.msk.bf16.mxu1 %vm2129_vm0, %v2128_v0  ;;  %1799 = vmatpush3.bf16.msra.mxu1 %v1978_v37  ;;  %v2017_v37 = vld [vmem:[#allocation5 + $0x50] ss:$8 sps:$4 sm:$0xff]  }
 0x145   : > { %1800 = vmatprep.subr.bf16.mxu1 %v2128_v0 }
 0x148   : > { %1801 = vmatpush3.bf16.msra.mxu1 %v1979_v38  ;;  %v1590_v38 = vld [vmem:[%s2395_s2 + $0x4] ss:$0 sm:$0xff] }
 0x149   : > { %1802 = vmatprep.subr.bf16.mxu1 %v2128_v0 }
 0x14c   : > { %1803 = vmatpush3.bf16.msra.mxu1 %v1980_v39 }
 0x14d   : > { %1804 = vmatprep.subr.bf16.mxu1 %v2128_v0 }
 0x150   : > { %1805 = vmatpush3.bf16.msra.mxu1 %v1981_v40 }
 0x151   : > { %1806 = vmatprep.subr.bf16.mxu1 %v2128_v0 }
 0x154   : > { %1807 = vmatpush3.bf16.msra.mxu1 %v1982_v41 }
 0x155   : > { %1808 = vmatprep.subr.bf16.mxu1 %v2128_v0 }
 0x158   : > { %1809 = vmatpush3.bf16.msra.mxu1 %v1983_v42 }
 0x159   : > { %1810 = vmatprep.subr.bf16.mxu1 %v2128_v0 }
 0x15c   : > { %1811 = vmatpush3.bf16.msra.mxu1 %v1984_v52  ;;  %v2026_v52 = vld [vmem:[#allocation3 + $0x180] sm:$0xff]  }
 0x15d   : > { %1812 = vmatprep.subr.bf16.mxu1 %v2128_v0 }
 0x160   : > { %1813 = vmatpush3.bf16.msra.mxu1 %v1985_v53  ;;  %v2027_v53 = vld [vmem:[#allocation3 + $0x188] sm:$0xff]  }
 0x161   : > { %1838 = vmatprep.subr.bf16.mxu1 %v2128_v0 }
 0x216   : > { %v482_v44 = vpop.f32.mrb[0].mxu1 }
 0x217   : > { %v483_v45 = vadd.f32 %v1560_v43, %v482_v44  ;;  %v1776_v46 = vpop.f32.mrb[1].mxu1 }
 0x218   : > { %v485_v47 = vpop.f32.mrb[2].mxu1 }
 0x219   : > { %vm488_vm3 = vcmp.ge.f32.partialorder %v483_v45, 0.0  ;;  %v489_v48 = vmul.f32 0.2, %v483_v45  ;;  %v1777_v49 = vpop.f32.mrb[3].mxu1  ;;  %v2022_v47 = vld [vmem:[#allocation5 + $0x64] ss:$8 sps:$4 sm:$0xff]  }
 0x21a   : > { %v2025_v49 = vld [vmem:[#allocation5 + $0x74] ss:$8 sps:$4 sm:$0xff]  }
 0x21b   : > { %v490_v50 = vsel %vm488_vm3, %v483_v45, %v489_v48  ;;  %v2020_v48 = vld [vmem:[#allocation5 + $0x60] ss:$8 sps:$4 sm:$0xff]  }
 0x21c   : > { %v491_v51 = vpack.c.bf16 %v490_v50, %v490_v50  ;;  %v2023_v50 = vld [vmem:[#allocation5 + $0x70] ss:$8 sps:$4 sm:$0xff]  }
 0x21e   : > { %1795 = vmatmul.mubr.bf16.vlgmr.msra.gmra.mrb[4].mxu0 %v491_v51  ;;  %v2130_v51 = vmov 0  }
 0x21f   : > { %1834 = vmatprep.mubr.msk.bf16.mxu0 %vm2129_vm0, %v2128_v0  ;;  %1819 = vmatpush3.bf16.msra.mxu0 %v1986_v54  ;;  %v2028_v54 = vld [vmem:[#allocation3 + $0x190] sm:$0xff]  }
 0x220   : > { %1820 = vmatprep.subr.bf16.mxu0 %v2128_v0 }
 0x223   : > { %1821 = vmatpush3.bf16.msra.mxu0 %v1987_v55  ;;  %v2029_v55 = vld [vmem:[#allocation3 + $0x198] sm:$0xff]  }
 0x224   : > { %1822 = vmatprep.subr.bf16.mxu0 %v2128_v0 }
 0x227   : > { %1823 = vmatpush3.bf16.msra.mxu0 %v1988_v56  ;;  %v2030_v56 = vld [vmem:[#allocation3 + $0x1a0] sm:$0xff]  }
 0x228   : > { %1824 = vmatprep.subr.bf16.mxu0 %v2128_v0 }
 0x22b   : > { %1825 = vmatpush3.bf16.msra.mxu0 %v1989_v57  ;;  %v2031_v57 = vld [vmem:[#allocation3 + $0x1a8] sm:$0xff]  }
 0x22c   : > { %1826 = vmatprep.subr.bf16.mxu0 %v2128_v0 }
 0x22f   : > { %1827 = vmatpush3.bf16.msra.mxu0 %v1990_v58  ;;  %v1600_v58 = vld [vmem:[%s2395_s2 + $0x5] ss:$0 sm:$0xff] }
 0x230   : > { %1828 = vmatprep.subr.bf16.mxu0 %v2128_v0 }
 0x233   : > { %1829 = vmatpush3.bf16.msra.mxu0 %v1991_v59 }
 0x234   : > { %1830 = vmatprep.subr.bf16.mxu0 %v2128_v0 }
 0x237   : > { %1831 = vmatpush3.bf16.msra.mxu0 %v1992_v60 }
 0x238   : > { %1832 = vmatprep.subr.bf16.mxu0 %v2128_v0 }
 0x23b   : > { %1833 = vmatpush3.bf16.msra.mxu0 %v1993_v7  ;;  %v2035_v7 = vld [vmem:[#allocation3 + $0x1c8] sm:$0xff]  }
 0x23c   : > { %1066 = vmatprep.subr.bf16.mxu0 %v2004_v28  ;;  %v2042_v28 = vld [vmem:[#allocation3 + $0x200] sm:$0xff]  }
 0x2f1   : > { %v599_v62 = vpop.f32.mrb[4].mxu0 }
 0x2f2   : > { %v600_v63 = vadd.f32 %v1570_v61, %v599_v62  ;;  %v1796_v1 = vpop.f32.mrb[5].mxu0 }
 0x2f3   : > { %v602_v2 = vpop.f32.mrb[6].mxu0 }
 0x2f4   : > { %vm605_vm4 = vcmp.ge.f32.partialorder %v600_v63, 0.0  ;;  %v606_v3 = vmul.f32 0.2, %v600_v63  ;;  %v1797_v4 = vpop.f32.mrb[7].mxu0 }
 0x2f5   : > { %v2032_v4 = vld [vmem:[#allocation3 + $0x1b0] sm:$0xff]  }
 0x2f6   : > { %v607_v5 = vsel %vm605_vm4, %v600_v63, %v606_v3 }
 0x2f7   : > { %v608_v6 = vpack.c.bf16 %v607_v5, %v607_v5  ;;  %v2033_v5 = vld [vmem:[#allocation3 + $0x1b8] sm:$0xff]  }
 0x2f9   : > { %1815 = vmatmul.mubr.bf16.vlgmr.msra.gmra.mrb[4].mxu1 %v608_v6  ;;  %v2034_v6 = vld [vmem:[#allocation3 + $0x1c0] sm:$0xff]  }
 0x2fa   : > { %1854 = vmatprep.mubr.msk.bf16.mxu1 %vm2129_vm0, %v2128_v0  ;;  %1839 = vmatpush3.bf16.msra.mxu1 %v1994_v8  ;;  %v2036_v8 = vld [vmem:[#allocation3 + $0x1d0] sm:$0xff]  }
 0x2fb   : > { %1840 = vmatprep.subr.bf16.mxu1 %v2128_v0 }
 0x2fe   : > { %1841 = vmatpush3.bf16.msra.mxu1 %v1995_v9  ;;  %v2037_v9 = vld [vmem:[#allocation3 + $0x1d8] sm:$0xff]  }
 0x2ff   : > { %1842 = vmatprep.subr.bf16.mxu1 %v2128_v0 }
 0x302   : > { %1843 = vmatpush3.bf16.msra.mxu1 %v1996_v10  ;;  %v2038_v10 = vld [vmem:[#allocation3 + $0x1e0] sm:$0xff]  }
 0x303   : > { %1844 = vmatprep.subr.bf16.mxu1 %v2128_v0 }
 0x306   : > { %1845 = vmatpush3.bf16.msra.mxu1 %v1997_v11  ;;  %v2039_v11 = vld [vmem:[#allocation3 + $0x1e8] sm:$0xff]  }
 0x307   : > { %1846 = vmatprep.subr.bf16.mxu1 %v2128_v0 }
 0x30a   : > { %1847 = vmatpush3.bf16.msra.mxu1 %v1998_v12  ;;  %v977_v12 = vshrl.u32 %v256_v14, 7  ;;  %v2040_v14 = vld [vmem:[#allocation3 + $0x1f0] sm:$0xff]  }
 0x30b   : > { %1848 = vmatprep.subr.bf16.mxu1 %v2128_v0 }
 0x30e   : > { %1849 = vmatpush3.bf16.msra.mxu1 %v1999_v13  ;;  %v978_v13 = vsub.s32 0, %v977_v12 }
 0x30f   : > { %1850 = vmatprep.subr.bf16.mxu1 %v2128_v0 }
 0x312   : > { %1851 = vmatpush3.bf16.msra.mxu1 %v2000_v25 }
 0x313   : > { %1852 = vmatprep.subr.bf16.mxu1 %v2128_v0 }
 0x316   : > { %1853 = vmatpush3.bf16.msra.mxu1 %v2001_v26 }
 0x317   : > { %1858 = vmatprep.subr.bf16.mxu1 %v2128_v0 }
 0x3cc   : > { %v716_v18 = vpop.f32.mrb[4].mxu1 }
 0x3cd   : > { %v2330_v19 = vadd.f32 %v1580_v17, %v716_v18  ;;  %v1816_v20 = vpop.f32.mrb[5].mxu1  ;;  %v979_v17 = vrot.slane %v974_v16, %v978_v13 }
 0x3ce   : > { %v719_v21 = vpop.f32.mrb[6].mxu1 }
 0x3cf   : > { %v722_v22 = vsel %vm258_vm5, %v2330_v19, %v2269_v15  ;;  %v1817_v23 = vpop.f32.mrb[7].mxu1  ;;  %v2008_v15 = vld [vmem:[#allocation5 + $0x20] ss:$8 sps:$4 sm:$0xff]  }
 0x3d0   : > { %v723_v24 = vpack.c.bf16 %v722_v22, %v722_v22 }
 0x3d2   : > { %1835 = vmatmul.mubr.bf16.vlgmr.msra.gmra.mrb[8].mxu0 %v723_v24 }
 0x3d3   : > { %1067 = vmatpush1.bf16.msra.mxu0 %v2002_v27  ;;  %1098 = vmatprep.mubr.bf16.mxu0 %v2130_v51  ;;  %v2041_v27 = vld [vmem:[#allocation3 + $0x1f8] sm:$0xff]  }
 0x3d4   : > { %1068 = vmatprep.subr.bf16.mxu0 %v2007_v29  ;;  %v2043_v29 = vld [vmem:[#allocation3 + $0x208] sm:$0xff]  }
 0x3d7   : > { %1069 = vmatpush1.bf16.msra.mxu0 %v2005_v30  ;;  %v2044_v30 = vld [vmem:[#allocation3 + $0x210] sm:$0xff]  }
 0x3d8   : > { %1070 = vmatprep.subr.bf16.mxu0 %v2010_v31  ;;  %v2045_v31 = vld [vmem:[#allocation3 + $0x218] sm:$0xff]  }
 0x3db   : > { %1071 = vmatpush1.bf16.msra.mxu0 %v2008_v15  ;;  %v2046_v15 = vld [vmem:[#allocation3 + $0x220] sm:$0xff]  }
 0x3dc   : > { %1072 = vmatprep.subr.bf16.mxu0 %v2013_v32  ;;  %v2047_v32 = vld [vmem:[#allocation3 + $0x228] sm:$0xff]  }
 0x3df   : > { %1073 = vmatpush1.bf16.msra.mxu0 %v2011_v33  ;;  %v1626_v33 = vld [vmem:[%s2395_s2 + $0x6] ss:$0 sm:$0xff] }
 0x3e0   : > { %1074 = vmatprep.subr.bf16.mxu0 %v2016_v34 }
 0x3e3   : > { %1075 = vmatpush1.bf16.msra.mxu0 %v2014_v35 }
 0x3e4   : > { %1076 = vmatprep.subr.bf16.mxu0 %v2019_v36 }
 0x3e7   : > { %1077 = vmatpush1.bf16.msra.mxu0 %v2017_v37 }
 0x3e8   : > { %1078 = vmatprep.subr.bf16.mxu0 %v2022_v47  ;;  %v1636_v47 = vld [vmem:[%s2395_s2 + $0x7] ss:$0 sm:$0xff] }
 0x3eb   : > { %1079 = vmatpush1.bf16.msra.mxu0 %v2020_v48 }
 0x3ec   : > { %1080 = vmatprep.subr.bf16.mxu0 %v2025_v49 }
 0x3ef   : > { %1081 = vmatpush1.bf16.msra.mxu0 %v2023_v50 }
 0x3f0   : > { %1878 = vmatprep.subr.bf16.mxu0 %v2128_v0 }
 0x4a5   : > { %v831_v39 = vpop.f32.mrb[8].mxu0 }
 0x4a6   : > { %v832_v40 = vadd.f32 %v1590_v38, %v831_v39  ;;  %v1836_v41 = vpop.f32.mrb[9].mxu0 }
 0x4a7   : > { %v834_v42 = vpop.f32.mrb[10].mxu0 }
 0x4a8   : > { %vm837_vm6 = vcmp.ge.f32.partialorder %v832_v40, 0.0  ;;  %v838_v43 = vmul.f32 0.2, %v832_v40  ;;  %v1837_v44 = vpop.f32.mrb[11].mxu0  ;;  %v2048_v42 = vld [vmem:[#allocation3 + $0x230] sm:$0xff]  }
 0x4a9   : > { %v982_v44 = vsub.s32 1, %v977_v12 }
 0x4aa   : > { %v839_v45 = vsel %vm837_vm6, %v832_v40, %v838_v43  ;;  %v2049_v43 = vld [vmem:[#allocation3 + $0x238] sm:$0xff]  }
 0x4ab   : > { %v840_v46 = vpack.c.bf16 %v839_v45, %v839_v45  ;;  %v983_v45 = vrot.slane %v974_v16, %v982_v44 }
 0x4ad   : > { %1855 = vmatmul.mubr.bf16.vlgmr.msra.gmra.mrb[8].mxu1 %v840_v46 }
 0x4ae   : > { %1874 = vmatprep.mubr.msk.bf16.mxu1 %vm2129_vm0, %v2128_v0  ;;  %1859 = vmatpush3.bf16.msra.mxu1 %v2026_v52 }
 0x4af   : > { %1860 = vmatprep.subr.bf16.mxu1 %v2128_v0 }
 0x4b2   : > { %1861 = vmatpush3.bf16.msra.mxu1 %v2027_v53 }
 0x4b3   : > { %1862 = vmatprep.subr.bf16.mxu1 %v2128_v0 }
 0x4b6   : > { %1863 = vmatpush3.bf16.msra.mxu1 %v2028_v54 }
 0x4b7   : > { %1864 = vmatprep.subr.bf16.mxu1 %v2128_v0 }
 0x4ba   : > { %1865 = vmatpush3.bf16.msra.mxu1 %v2029_v55 }
 0x4bb   : > { %1866 = vmatprep.subr.bf16.mxu1 %v2128_v0 }
 0x4be   : > { %1867 = vmatpush3.bf16.msra.mxu1 %v2030_v56 }
 0x4bf   : > { %1868 = vmatprep.subr.bf16.mxu1 %v2128_v0 }
 0x4c2   : > { %1869 = vmatpush3.bf16.msra.mxu1 %v2031_v57 }
 0x4c3   : > { %1870 = vmatprep.subr.bf16.mxu1 %v2128_v0 }
 0x4c6   : > { %1871 = vmatpush3.bf16.msra.mxu1 %v2032_v4 }
 0x4c7   : > { %1872 = vmatprep.subr.bf16.mxu1 %v2128_v0 }
 0x4ca   : > { %1873 = vmatpush3.bf16.msra.mxu1 %v2033_v5 }
 0x4cb   : > { %1898 = vmatprep.subr.bf16.mxu1 %v2128_v0 }
 0x580   : > { %v948_v59 = vpop.f32.mrb[8].mxu1 }
 0x581   : > { %v949_v60 = vadd.f32 %v1600_v58, %v948_v59  ;;  %v1856_v61 = vpop.f32.mrb[9].mxu1  ;;  %v1646_v58 = vld [vmem:[%s2395_s2 + $0x8] ss:$0 sm:$0xff] }
 0x582   : > { %v951_v62 = vpop.f32.mrb[10].mxu1 }
 0x583   : > { %vm954_vm7 = vcmp.ge.f32.partialorder %v949_v60, 0.0  ;;  %v955_v63 = vmul.f32 0.2, %v949_v60  ;;  %v1857_v1 = vpop.f32.mrb[11].mxu1 }
 0x585   : > { %v956_v2 = vsel %vm954_vm7, %v949_v60, %v955_v63 }
 0x586   : > { %v957_v3 = vpack.c.bf16 %v956_v2, %v956_v2 }
 0x588   : > { %1099 = vmatmul.mubr.bf16.vlgmr.msra.gmra.mrb[12].mxu0 %v957_v3 }
 0x589   : > { %1894 = vmatprep.mubr.msk.bf16.mxu0 %vm2129_vm0, %v2128_v0  ;;  %1879 = vmatpush3.bf16.msra.mxu0 %v2034_v6 }
 0x58a   : > { %1880 = vmatprep.subr.bf16.mxu0 %v2128_v0 }
 0x58d   : > { %1881 = vmatpush3.bf16.msra.mxu0 %v2035_v7 }
 0x58e   : > { %1882 = vmatprep.subr.bf16.mxu0 %v2128_v0 }
 0x591   : > { %1883 = vmatpush3.bf16.msra.mxu0 %v2036_v8 }
 0x592   : > { %1884 = vmatprep.subr.bf16.mxu0 %v2128_v0 }
 0x595   : > { %1885 = vmatpush3.bf16.msra.mxu0 %v2037_v9 }
 0x596   : > { %1886 = vmatprep.subr.bf16.mxu0 %v2128_v0 }
 0x599   : > { %1887 = vmatpush3.bf16.msra.mxu0 %v2038_v10 }
 0x59a   : > { %1888 = vmatprep.subr.bf16.mxu0 %v2128_v0 }
 0x59d   : > { %1889 = vmatpush3.bf16.msra.mxu0 %v2039_v11 }
 0x59e   : > { %1890 = vmatprep.subr.bf16.mxu0 %v2128_v0 }
 0x5a1   : > { %1891 = vmatpush3.bf16.msra.mxu0 %v2040_v14 }
 0x5a2   : > { %1892 = vmatprep.subr.bf16.mxu0 %v2128_v0 }
 0x5a5   : > { %1893 = vmatpush3.bf16.msra.mxu0 %v2041_v27 }
 0x65b   : > { %v1100_v18 = vpop.f32.mrb[12].mxu0 }
 0x65c   : > { %v1101_v20 = vadd.f32 %v1100_v18, %v979_v17  ;;  %v1102_v21 = vpop.f32.mrb[13].mxu0 }
 0x65d   : > { %v1104_v22 = vpop.f32.mrb[14].mxu0  ;;  %v1103_v46 = vadd.f32 %v1102_v21, %v983_v45 }
 0x65e   : > { %vm1107_vm8 = vcmp.ge.f32.partialorder %v1101_v20, 0.0  ;;  %v1109_v23 = vmul.f32 0.2, %v1101_v20  ;;  %v1105_v24 = vpop.f32.mrb[15].mxu0 }
 0x65f   : > { %v1110_v49 = vmul.f32 0.2, %v1103_v46  ;;  %vm1108_vm10 = vcmp.ge.f32.partialorder %v1103_v46, 0.0 }
 0x660   : > { %v1111_v25 = vsel %vm1107_vm8, %v1101_v20, %v1109_v23 }
 0x661   : > { %v1113_v26 = vpack.c.bf16 %v1111_v25, %v1111_v25 }
 0x663   : > { %1875 = vmatmul.mubr.bf16.vlgmr.msra.gmra.mrb[12].mxu1 %v1113_v26 }
 0x664   : > { %1914 = vmatprep.mubr.msk.bf16.mxu1 %vm2129_vm0, %v2128_v0  ;;  %1899 = vmatpush3.bf16.msra.mxu1 %v2042_v28 }
 0x665   : > { %1900 = vmatprep.subr.bf16.mxu1 %v2128_v0 }
 0x668   : > { %1901 = vmatpush3.bf16.msra.mxu1 %v2043_v29 }
 0x669   : > { %1902 = vmatprep.subr.bf16.mxu1 %v2128_v0 }
 0x66c   : > { %1903 = vmatpush3.bf16.msra.mxu1 %v2044_v30 }
 0x66d   : > { %1904 = vmatprep.subr.bf16.mxu1 %v2128_v0 }
 0x670   : > { %1905 = vmatpush3.bf16.msra.mxu1 %v2045_v31 }
 0x671   : > { %1906 = vmatprep.subr.bf16.mxu1 %v2128_v0 }
 0x674   : > { %1907 = vmatpush3.bf16.msra.mxu1 %v2046_v15 }
 0x675   : > { %1908 = vmatprep.subr.bf16.mxu1 %v2128_v0 }
 0x678   : > { %1909 = vmatpush3.bf16.msra.mxu1 %v2047_v32 }
 0x679   : > { %1910 = vmatprep.subr.bf16.mxu1 %v2128_v0 }
 0x67c   : > { %1911 = vmatpush3.bf16.msra.mxu1 %v2048_v42 }
 0x67d   : > { %1912 = vmatprep.subr.bf16.mxu1 %v2128_v0  ;;  %v1112_v0 = vsel %vm1108_vm10, %v1103_v46, %v1110_v49 }
 0x680   : > { %1913 = vmatpush3.bf16.msra.mxu1 %v2049_v43 }
 0x736   : > { %v1221_v34 = vpop.f32.mrb[12].mxu1 }
 0x737   : > { %v1222_v35 = vadd.f32 %v1626_v33, %v1221_v34  ;;  %v1876_v36 = vpop.f32.mrb[13].mxu1 }
 0x738   : > { %v1224_v37 = vpop.f32.mrb[14].mxu1 }
 0x739   : > { %vm1227_vm9 = vcmp.ge.f32.partialorder %v1222_v35, 0.0  ;;  %v1228_v38 = vmul.f32 0.2, %v1222_v35  ;;  %v1877_v39 = vpop.f32.mrb[15].mxu1 }
 0x73b   : > { %v1229_v40 = vsel %vm1227_vm9, %v1222_v35, %v1228_v38 }
 0x73c   : > { %v1230_v41 = vpack.c.bf16 %v1229_v40, %v1229_v40 }
 0x73e   : > { %1895 = vmatmul.mubr.bf16.vlgmr.msra.gmra.mrb[16].mxu0 %v1230_v41 }
 0x811   : > { %v1338_v48 = vpop.f32.mrb[16].mxu0 }
 0x812   : > { %v1339_v50 = vadd.f32 %v1636_v47, %v1338_v48  ;;  %v1896_v51 = vpop.f32.mrb[17].mxu0 }
 0x813   : > { %v1341_v52 = vpop.f32.mrb[18].mxu0 }
 0x814   : > { %vm1344_vm11 = vcmp.ge.f32.partialorder %v1339_v50, 0.0  ;;  %v1345_v53 = vmul.f32 0.2, %v1339_v50  ;;  %v1897_v54 = vpop.f32.mrb[19].mxu0 }
 0x816   : > { %v1346_v55 = vsel %vm1344_vm11, %v1339_v50, %v1345_v53 }
 0x817   : > { %v1347_v56 = vadd.f32 %v1346_v55, %v1112_v0 }
 0x819   : > { %v1348_v57 = vpack.c.bf16 %v1347_v56, %v1347_v56 }
 0x81b   : > { %1915 = vmatmul.mubr.bf16.vlgmr.msra.gmra.mrb[16].mxu1 %v1348_v57 }
 0x8ee   : > { %v1456_v59 = vpop.f32.mrb[16].mxu1 }
 0x8ef   : > { %v1457_v60 = vadd.f32 %v1646_v58, %v1456_v59  ;;  %v1916_v61 = vpop.f32.mrb[17].mxu1 }
 0x8f0   : > { %v1459_v62 = vpop.f32.mrb[18].mxu1 }
 0x8f1   : > { %v1462_v63 = vadd.f32 %v1457_v60, %v2330_v19  ;;  %v1917_v1 = vpop.f32.mrb[19].mxu1 }
 0x8f3   : > { %1463 = vst [vmem:[%s249_s6] sm:$0xff] %v1462_v63 }
 0x8f4 PF: > { %s17_s18 = sadd.s32 1, %s2120_s18  }
 0x8f5   : > { %p14_p9 = scmp.ge.s32.totalorder %s17_s18, 4  }
 0x8f7   :  { %16 = sbr.rel (!%p14_p9) target bundleno = 2 (0x2), region = 95 }
 0x8fe   :  { %1483 = vsyncpa [#allocation4], 1 }
 0x8ff   :  { %1485 = vsyncpa [#allocation4 + $0x1], 1 }
 0x900   :  { %1486 = vsyncpa [#allocation6], 1 }

</bundles_post_ra>
